<compile_context>
chip_gen: v7x
topology: tpu7x:2x2x1
jax: 0.10.0
libtpu: 0.0.40
codegen_flags: <defaults>
</compile_context>

<pallas_src>
import functools

import jax
import jax.numpy as jnp
from jax.experimental import pallas as pl
from jax.experimental.pallas import tpu as pltpu

NCORES = 2          # leading "parallel" grid axis (exploited on v7x megacore)
MAX_BM = 256        # max sublane rows per block
BIG = 1e30          # finite sentinel: softplus(-BIG) == softplus(-(BIG)) == 0


def _gan_loss_kernel(real_ref, fake_ref, acc_ref):
    """Per-step: acc += softplus(-real) + softplus(fake), pure VPU/EUP work.

    acc_ref is the (bm, lanew) output block for this core; it stays resident
    across the 'arbitrary' reduction axis and is zeroed on the first step.
    """
    @pl.when(pl.program_id(1) == 0)
    def _():
        acc_ref[...] = jnp.zeros_like(acc_ref)

    x_r = real_ref[...].astype(jnp.float32)
    x_f = fake_ref[...].astype(jnp.float32)

    # BCEWithLogits(x, 1) = softplus(-x) = max(-x, 0) + log1p(exp(-|x|))
    sp_r = jnp.maximum(-x_r, 0.0) + jnp.log1p(jnp.exp(-jnp.abs(x_r)))
    # BCEWithLogits(x, 0) = softplus( x) = max( x, 0) + log1p(exp(-|x|))
    sp_f = jnp.maximum(x_f, 0.0) + jnp.log1p(jnp.exp(-jnp.abs(x_f)))

    acc_ref[...] += sp_r + sp_f


def _ceil_to(x, m):
    return ((x + m - 1) // m) * m


def _plan(n):
    """Choose lane width, block rows, padded rows and steps-per-core for n elems."""
    lanew = 1024 if n >= 8 * 1024 else 128
    rows_needed = -(-n // lanew)
    rows_per_core = -(-rows_needed // NCORES)
    bm = min(MAX_BM, _ceil_to(max(rows_per_core, 1), 8))
    rows_padded = _ceil_to(max(rows_needed, 1), NCORES * bm)
    steps = rows_padded // (NCORES * bm)
    return lanew, bm, rows_padded, steps


def _prep(x, pad_val, lanew, rows_padded):
    """Flatten to a lane-dense (rows_padded, lanew) slab, padding with pad_val."""
    flat = x.reshape(-1)
    total = rows_padded * lanew
    pad = total - flat.shape[0]
    if pad:
        flat = jnp.pad(flat, (0, pad), constant_values=pad_val)
    return flat.reshape(rows_padded, lanew)


@functools.partial(jax.jit)
def gan_loss_vanilla(pred_real, pred_fake):
    """0.5 * (BCEWithLogits(pred_real, 1) + BCEWithLogits(pred_fake, 0)), mean reduction."""
    assert pred_real.shape == pred_fake.shape, "fused kernel assumes matching shapes"
    n = pred_real.size
    lanew, bm, rows_padded, steps = _plan(n)

    # Sentinel padding: softplus(-(+BIG)) == 0 and softplus(-BIG) == 0 exactly,
    # so padded elements contribute nothing -> no mask stream needed.
    real2d = _prep(pred_real, BIG, lanew, rows_padded)
    fake2d = _prep(pred_fake, -BIG, lanew, rows_padded)

    grid = (NCORES, steps)
    in_spec = pl.BlockSpec((bm, lanew), lambda c, i, s=steps: (c * s + i, 0))
    # Each core accumulates into its own (bm, lanew) slab of the output.
    out_spec = pl.BlockSpec((bm, lanew), lambda c, i: (c, 0))

    partials = pl.pallas_call(
        _gan_loss_kernel,
        out_shape=jax.ShapeDtypeStruct((NCORES * bm, lanew), jnp.float32),
        grid_spec=pltpu.PrefetchScalarGridSpec(
            num_scalar_prefetch=0,
            grid=grid,
            in_specs=[in_spec, in_spec],
            out_specs=out_spec,
        ),
        compiler_params=pltpu.CompilerParams(
            dimension_semantics=("parallel", "arbitrary")),
    )(real2d, fake2d)

    # Glue: single final reduce of the per-lane partials, then mean + 0.5 factor.
    return 0.5 * jnp.sum(partials) / jnp.float32(n)


def gan_loss_wgan_gp(pred_real, pred_fake, gradient_penalty, lambda_gp=10.0):
    """wgan-gp branch: -mean(real) + mean(fake) + lambda_gp * gp (simple glue)."""
    # TODO(synk): PyTorch forward() for mode='wgan-gp' calls _wgan_gp_loss without
    # the `gradient_penalty` argument (would raise); exposed here with gp explicit.
    mean_r = jnp.mean(pred_real.astype(jnp.float32))
    mean_f = jnp.mean(pred_fake.astype(jnp.float32))
    return -mean_r + mean_f + lambda_gp * gradient_penalty


def _reference_vanilla(pred_real, pred_fake):
    sp_r = jax.nn.softplus(-pred_real.astype(jnp.float32))
    sp_f = jax.nn.softplus(pred_fake.astype(jnp.float32))
    return 0.5 * (jnp.mean(sp_r) + jnp.mean(sp_f))


if __name__ == "__main__":
    key = jax.random.PRNGKey(0)
    # Discriminator logits, NCHW (as the PyTorch module would receive).
    # Second shape is deliberately not a multiple of the tile to exercise padding.
    for shape in [(2, 1, 16, 16), (2, 1, 17, 17)]:
        k1, k2 = jax.random.split(jax.random.fold_in(key, shape[-1]))
        pred_real = jax.random.normal(k1, shape, dtype=jnp.float32) * 3.0
        pred_fake = jax.random.normal(k2, shape, dtype=jnp.float32) * 3.0

        loss = gan_loss_vanilla(pred_real, pred_fake)
        jax.block_until_ready(loss)

        ref = _reference_vanilla(pred_real, pred_fake)
        assert jnp.allclose(loss, ref, atol=1e-5, rtol=1e-5), (shape, loss, ref)

    print("KERNEL_OK")
</pallas_src>

<mosaic_0001>
module attributes {stable_mosaic.version = 11 : i64} {
  func.func @_gan_loss_kernel(%arg0: i32, %arg1: i32, %arg2: memref<8x128xf32, #tpu.memory_space<vmem>>, %arg3: memref<8x128xf32, #tpu.memory_space<vmem>>, %arg4: memref<8x128xf32, #tpu.memory_space<vmem>>) attributes {dimension_semantics = [#tpu.dimension_semantics<parallel>, #tpu.dimension_semantics<arbitrary>], iteration_bounds = array<i64: 2, 1>, scalar_prefetch = 0 : i64, scratch_operands = 0 : i64, tpu.core_type = #tpu.core_type<tc>, window_params = [{transform_indices = @transform_0, window_bounds = array<i64: 8, 128>}, {transform_indices = @transform_1, window_bounds = array<i64: 8, 128>}, {transform_indices = @transform_2, window_bounds = array<i64: 8, 128>}]} {
    %c0_i32 = arith.constant 0 : i32
    %0 = arith.cmpi eq, %arg1, %c0_i32 : i32
    %1 = arith.extui %0 : i1 to i32
    %c0_i32_0 = arith.constant 0 : i32
    %2 = arith.cmpi ne, %1, %c0_i32_0 : i32
    scf.if %2 {
      %cst_12 = arith.constant 0.000000e+00 : f32
      %27 = vector.broadcast %cst_12 : f32 to vector<8x128xf32>
      %c0_13 = arith.constant 0 : index
      %c0_14 = arith.constant 0 : index
      %28 = vector.load %arg4[%c0_13, %c0_14] : memref<8x128xf32, #tpu.memory_space<vmem>>, vector<8x128xf32>
      tpu.vector_store %arg4[%c0_13, %c0_14], %27 {strides = array<i32>} : memref<8x128xf32, #tpu.memory_space<vmem>>, vector<8x128xf32>,
    } else {
    }
    %c0 = arith.constant 0 : index
    %c0_1 = arith.constant 0 : index
    %3 = vector.load %arg2[%c0, %c0_1] : memref<8x128xf32, #tpu.memory_space<vmem>>, vector<8x128xf32>
    %c0_2 = arith.constant 0 : index
    %c0_3 = arith.constant 0 : index
    %4 = vector.load %arg3[%c0_2, %c0_3] : memref<8x128xf32, #tpu.memory_space<vmem>>, vector<8x128xf32>
    %cst = arith.constant 0.000000e+00 : f32
    %5 = vector.broadcast %cst : f32 to vector<8x128xf32>
    %6 = arith.subf %5, %3 : vector<8x128xf32>
    %cst_4 = arith.constant 0.000000e+00 : f32
    %7 = vector.broadcast %cst_4 : f32 to vector<8x128xf32>
    %8 = arith.maximumf %6, %7 : vector<8x128xf32>
    %9 = math.absf %3 : vector<8x128xf32>
    %cst_5 = arith.constant 0.000000e+00 : f32
    %10 = vector.broadcast %cst_5 : f32 to vector<8x128xf32>
    %11 = arith.subf %10, %9 : vector<8x128xf32>
    %12 = math.exp %11 : vector<8x128xf32>
    %13 = math.log1p %12 : vector<8x128xf32>
    %14 = arith.addf %8, %13 : vector<8x128xf32>
    %cst_6 = arith.constant 0.000000e+00 : f32
    %15 = vector.broadcast %cst_6 : f32 to vector<8x128xf32>
    %16 = arith.maximumf %4, %15 : vector<8x128xf32>
    %17 = math.absf %4 : vector<8x128xf32>
    %cst_7 = arith.constant 0.000000e+00 : f32
    %18 = vector.broadcast %cst_7 : f32 to vector<8x128xf32>
    %19 = arith.subf %18, %17 : vector<8x128xf32>
    %20 = math.exp %19 : vector<8x128xf32>
    %21 = math.log1p %20 : vector<8x128xf32>
    %22 = arith.addf %16, %21 : vector<8x128xf32>
    %c0_8 = arith.constant 0 : index
    %c0_9 = arith.constant 0 : index
    %23 = vector.load %arg4[%c0_8, %c0_9] : memref<8x128xf32, #tpu.memory_space<vmem>>, vector<8x128xf32>
    %24 = arith.addf %14, %22 : vector<8x128xf32>
    %25 = arith.addf %23, %24 : vector<8x128xf32>
    %c0_10 = arith.constant 0 : index
    %c0_11 = arith.constant 0 : index
    %26 = vector.load %arg4[%c0_10, %c0_11] : memref<8x128xf32, #tpu.memory_space<vmem>>, vector<8x128xf32>
    tpu.vector_store %arg4[%c0_10, %c0_11], %25 {strides = array<i32>} : memref<8x128xf32, #tpu.memory_space<vmem>>, vector<8x128xf32>,
    return
  }
  func.func @transform_0(%arg0: i32, %arg1: i32) -> (i32, i32) {
    %c1_i32 = arith.constant 1 : i32
    %0 = arith.muli %arg0, %c1_i32 : i32
    %1 = arith.addi %0, %arg1 : i32
    %c0_i32 = arith.constant 0 : i32
    %c0_i32_0 = arith.constant 0 : i32
    return %1, %c0_i32 : i32, i32
  }
  func.func @transform_1(%arg0: i32, %arg1: i32) -> (i32, i32) {
    %c1_i32 = arith.constant 1 : i32
    %0 = arith.muli %arg0, %c1_i32 : i32
    %1 = arith.addi %0, %arg1 : i32
    %c0_i32 = arith.constant 0 : i32
    %c0_i32_0 = arith.constant 0 : i32
    return %1, %c0_i32 : i32, i32
  }
  func.func @transform_2(%arg0: i32, %arg1: i32) -> (i32, i32) {
    %c0_i32 = arith.constant 0 : i32
    %c0_i32_0 = arith.constant 0 : i32
    return %arg0, %c0_i32 : i32, i32
  }
}

</mosaic_0001>

<bundles_post_ra>
// kernel: gan_loss_vanilla.1
= control target key start
LH: loop header
LB: loop body
LE: loop exit
PB: predicated region body
PF: predicated region fallthrough
CT: control target
= control target key end

     0   :  { %s379_s9 = smov 0   ;;  %s381_s10 = smov 0   ;;  %s420_s0 = inlined_call_operand.vmem [shape: f32[16,128], index: 0, kind: input, shape index: {}]   ;;  %s421_s1 = inlined_call_operand.vmem [shape: f32[16,128], index: 1, kind: input, shape index: {}]   ;;  %s422_s2 = inlined_call_operand.vmem [shape: f32[16,128], index: 2, kind: output, shape index: {}]  }
   0x1   :  { %s383_s11 = smov 0  }
   0x2 LB: > { %s24_s12 = sadd.s32 1, %s358_s10  ;;  %p301_p0 = scmp.ge.s32.totalorder %s362_s11, 1  ;;  %s362_s11 = sphi %s383_s11, %s12_s11   ;;  %s358_s10 = sphi %s381_s10, %s424_s10   ;;  %s354_s9 = sphi %s379_s9, %s423_s9  }
   0x3   : > { %p26_p1 = scmp.ge.s32.totalorder %s24_s12, 2  ;;  %p140_p2 = scmp.lt.s32.totalorder %s362_s11, 3 }
   0x5   : > { %s426_s12 = smov (%p26_p1, %s24_s12), 0  ;;  %p141_p3 = pnand %p301_p0, %p140_p2 }
   0x6   : > { %p167_p4 = scmp.lt.s32.totalorder (!%p141_p3), %s354_s9, 1 }
   0x7   : > { %144 = sbr.rel (%p141_p3) target bundleno = 57 (0x39), region = 28 }
   0xe   : > { %s428_s9 = smov (!%p167_p4, %s354_s9), 1 }
   0xf   : > { %s397_s13 = sshll.u32 %s428_s9, 3 }
  0x10   : > { %s170_s16 = scalar_lea.vmem %s420_s0, %s397_s13  ;;  %s176_s19 = scalar_lea.vmem %s421_s1, %s397_s13 }
  0x11   : > { %v187_v0 = vld [vmem:[%s170_s16] sm:$0xff]  ;;  %s181_s22 = scalar_lea.vmem %s422_s2, %s397_s13 }
  0x12   : > { %v188_v1 = vld [vmem:[%s176_s19] sm:$0xff]  ;;  %v191_v2 = vand.u32 2147483647, %v187_v0  ;;  %v189_v15 = vsub.f32 0.0, %v187_v0 }
  0x13   : > { %v206_v3 = vand.u32 2147483647, %v188_v1  ;;  %v205_v24 = vmax.f32 %v188_v1, 0.0 }
  0x14   : > { %v192_v4 = vsub.f32 0.0, %v191_v2  ;;  %v190_v21 = vmax.f32 %v189_v15, 0.0 }
  0x15   : > { %v207_v5 = vsub.f32 0.0, %v206_v3 }
  0x16   : > { %v193_v6 = vmul.f32 1.442695, %v192_v4 }
  0x17   : > { %v208_v7 = vmul.f32 1.442695, %v207_v5 }
  0x18   : > { %332 = vpow2.f32 %v193_v6 }
  0x19   : > { %334 = vpow2.f32 %v208_v7 }
  0x22   : > { %v333_v8 = vpop.eup %332 }
  0x23   : > { %v335_v9 = vpop.eup %334  ;;  %v195_v10 = vadd.f32 1.0, %v333_v8  ;;  %v198_v12 = vmul.f32 -0.5, %v333_v8  ;;  %v201_v16 = vand.u32 2147483647, %v333_v8 }
  0x24   : > { %v210_v11 = vadd.f32 1.0, %v335_v9  ;;  %v213_v13 = vmul.f32 -0.5, %v335_v9  ;;  %v216_v18 = vand.u32 2147483647, %v335_v9 }
  0x25   : > { %336 = vlog2.f32 %v195_v10  ;;  %v199_v14 = vadd.f32 1.0, %v198_v12  ;;  %vm202_vm0 = vcmp.lt.f32.partialorder %v201_v16, 0.0004427343 }
  0x26   : > { %338 = vlog2.f32 %v210_v11  ;;  %v214_v17 = vadd.f32 1.0, %v213_v13  ;;  %vm217_vm1 = vcmp.lt.f32.partialorder %v216_v18, 0.0004427343 }
  0x27   : > { %v200_v19 = vmul.f32 %v333_v8, %v199_v14 }
  0x28   : > { %v215_v22 = vmul.f32 %v335_v9, %v214_v17 }
  0x2f   : > { %v337_v20 = vpop.eup %336 }
  0x30   : > { %v339_v23 = vpop.eup %338  ;;  %v197_v25 = vmul.f32 0.6931472, %v337_v20 }
  0x31   : > { %v212_v26 = vmul.f32 0.6931472, %v339_v23 }
  0x32   : > { %v203_v27 = vsel %vm202_vm0, %v200_v19, %v197_v25 }
  0x33   : > { %v204_v28 = vadd.f32 %v203_v27, %v190_v21  ;;  %v218_v29 = vsel %vm217_vm1, %v215_v22, %v212_v26 }
  0x34   : > { %v219_v30 = vadd.f32 %v218_v29, %v205_v24 }
  0x36   : > { %v221_v31 = vadd.f32 %v219_v30, %v204_v28 }
  0x38   : > { %223 = vst [vmem:[%s181_s22] sm:$0xff] %v221_v31 }
  0x39 PF: > { %s12_s11 = sadd.s32 1, %s362_s11   ;;  %s423_s9 = smov %s358_s10 }
  0x3a   : > { %p9_p5 = scmp.ge.s32.totalorder %s12_s11, 4   ;;  %s424_s10 = smov %s426_s12 }
  0x3c   :  { %11 = sbr.rel (!%p9_p5) target bundleno = 2 (0x2), region = 65 }

</bundles_post_ra>
